<compile_context>
chip_gen: v5e
topology: v5e:2x2
jax: 0.10.0
libtpu: 0.0.40
codegen_flags: <defaults>
</compile_context>

<pallas_src>
import functools

import jax
import jax.numpy as jnp
from jax.experimental import pallas as pl
from jax.experimental.pallas import tpu as pltpu


def _round_up(a, b):
    return (a + b - 1) // b * b


def _mdn_kernel(x_ref, w_ref, b_ref, g_ref, out_ref, *, KO):
    # Fused linear: one MXU push, f32 accumulation, f32 bias add.
    lg = jnp.dot(x_ref[...], w_ref[...],
                 preferred_element_type=jnp.float32) + b_ref[...]   # (tm, W)

    lane = jax.lax.broadcasted_iota(jnp.int32, lg.shape, 1)
    is_pi = lane < KO
    is_sigma = (lane >= KO) & (lane < 2 * KO)

    # Per-row max over the pi lanes (one masked full-width XLU reduction).
    # Softmax is shift-invariant per group, so a per-row max is valid for
    # every per-output-index group and keeps everything vreg-wide.
    m = jnp.max(jnp.where(is_pi, lg, jnp.float32(-1e30)),
                axis=1, keepdims=True)                               # (tm, 1)

    # One full-width exp covers both the (shifted) pi lanes and the raw sigma
    # lanes; mu / pad lanes are clamped to 0 so nothing overflows.
    arg = jnp.where(is_pi, lg - m, jnp.where(is_sigma, lg, 0.0))
    e = jnp.exp(arg)                                                 # (tm, W)

    # Group-sum broadcast for the softmax denominator: tiny MXU matmul against
    # a constant 0/1 matrix (identity on non-pi lanes keeps it finite there).
    # bf16 hi/lo split => f32-accurate sum with plain bf16 MXU passes.
    g = g_ref[...]
    e_hi = e.astype(jnp.bfloat16)
    e_lo = (e - e_hi.astype(jnp.float32)).astype(jnp.bfloat16)
    s = (jnp.dot(e_hi, g, preferred_element_type=jnp.float32) +
         jnp.dot(e_lo, g, preferred_element_type=jnp.float32))       # (tm, W)

    probs = e * pl.reciprocal(s, approx=True)

    # Packed output: pi | exp(sigma) | mu (raw)  at lane offsets 0 / KO / 2KO.
    out = jnp.where(is_pi, probs, jnp.where(is_sigma, e, lg))
    out_ref[...] = out.astype(out_ref.dtype)


def mdn_forward(x, w, b, *, K, output_size, tm_max=1024):
    """x: (B, S, input_size); w: (input_size, 3*K*O); b: (3*K*O,).

    Column order of w/b matches torch: [pi | sigma | mu], each group K-major
    (column k*O + o), i.e. exactly nn.Linear followed by torch.split + view.
    """
    B, S, input_size = x.shape
    O = output_size
    KO = K * O
    W = max(128, _round_up(3 * KO, 128))        # lane-dense packed width
    M = B * S

    # Row tiling: multiple of 16 (bf16 sublane packing), up to tm_max.
    tm = min(tm_max, _round_up(M, 16))
    grid_m = (M + tm - 1) // tm
    # v7x: keep >= 2 grid steps so the "parallel" axis uses both TensorCores.
    while grid_m < 2 and tm > 16:
        tm = max(16, _round_up(tm // 2, 16))
        grid_m = (M + tm - 1) // tm

    # No materialized zero-padded x copy: just flatten + cast for the MXU;
    # the partial last row-block (if any) is handled by Pallas.
    x2 = x.reshape(M, input_size).astype(jnp.bfloat16)

    # Fused, lane-dense weight / bias.
    w_f = jnp.pad(w.astype(jnp.bfloat16), ((0, 0), (0, W - 3 * KO)))
    b_f = jnp.pad(b.astype(jnp.float32), (0, W - 3 * KO)).reshape(1, W)

    # Constant group-sum-broadcast matrix: for pi lanes p,q (< KO), G[p,q]=1
    # iff they belong to the same softmax group (same output index o = lane%O);
    # identity elsewhere so the denominator stays finite on non-pi lanes.
    lane = jnp.arange(W)
    p_idx, q_idx = lane[:, None], lane[None, :]
    same_group = (p_idx < KO) & (q_idx < KO) & ((p_idx % O) == (q_idx % O))
    ident = (p_idx == q_idx) & (q_idx >= KO)
    g_mat = (same_group | ident).astype(jnp.bfloat16)

    kernel = functools.partial(_mdn_kernel, KO=KO)

    out = pl.pallas_call(
        kernel,
        out_shape=jax.ShapeDtypeStruct((M, W), jnp.float32),
        grid=(grid_m,),
        in_specs=[
            pl.BlockSpec((tm, input_size), lambda i: (i, 0)),   # x rows
            pl.BlockSpec((input_size, W), lambda i: (0, 0)),    # fused weight
            pl.BlockSpec((1, W), lambda i: (0, 0)),             # fused bias
            pl.BlockSpec((W, W), lambda i: (0, 0)),             # group matrix
        ],
        out_specs=pl.BlockSpec((tm, W), lambda i: (i, 0)),
        compiler_params=pltpu.CompilerParams(
            dimension_semantics=("parallel",)),
    )(x2, w_f, b_f, g_mat)

    pi = out[:, 0:KO].reshape(B, S, K, O)
    sigma = out[:, KO:2 * KO].reshape(B, S, K, O)
    mu = out[:, 2 * KO:3 * KO].reshape(B, S, K, O)
    return pi, sigma, mu


def mdn_forward_ref(x, w, b, *, K, output_size):
    """Pure-JAX reference matching the PyTorch forward (bf16 matmul inputs,
    f32 accumulation — same precision contract as the kernel)."""
    B, S, _ = x.shape
    O = output_size
    KO = K * O
    xb = x.astype(jnp.bfloat16).astype(jnp.float32)
    wb = w.astype(jnp.bfloat16).astype(jnp.float32)
    out = jnp.einsum("bsi,io->bso", xb, wb) + b.astype(jnp.float32)
    pi_raw, sigma_raw, mu_raw = (
        out[..., :KO], out[..., KO:2 * KO], out[..., 2 * KO:])
    sigma = jnp.exp(sigma_raw).reshape(B, S, K, O)
    mu = mu_raw.reshape(B, S, K, O)
    pi = jax.nn.softmax(pi_raw.reshape(B, S, K, O), axis=2)
    return pi, sigma, mu


if __name__ == "__main__":
    # Small shapes consistent with the module: x is (batch, seq, input_size).
    B, S = 2, 8
    input_size = 16
    output_size = 3
    K = 4

    key = jax.random.PRNGKey(0)
    kx, kw, kb = jax.random.split(key, 3)

    x = jax.random.normal(kx, (B, S, input_size), dtype=jnp.float32)
    # nn.Linear(input_size, 3*K*output_size): weight (3KO, in), bias (3KO,).
    # We pass the transposed weight (in, 3KO) to the wrapper.
    bound = 1.0 / jnp.sqrt(input_size)
    w = jax.random.uniform(kw, (input_size, 3 * K * output_size),
                           minval=-bound, maxval=bound, dtype=jnp.float32)
    b = jax.random.uniform(kb, (3 * K * output_size,),
                           minval=-bound, maxval=bound, dtype=jnp.float32)

    pi, sigma, mu = mdn_forward(x, w, b, K=K, output_size=output_size)
    jax.block_until_ready((pi, sigma, mu))

    pi_r, sigma_r, mu_r = mdn_forward_ref(x, w, b, K=K, output_size=output_size)
    assert pi.shape == (B, S, K, output_size)
    assert sigma.shape == (B, S, K, output_size)
    assert mu.shape == (B, S, K, output_size)
    assert jnp.allclose(mu, mu_r, atol=1e-4), "mu mismatch"
    assert jnp.allclose(sigma, sigma_r, atol=1e-4), "sigma mismatch"
    # pi tolerance relaxed: approx EUP reciprocal in the softmax denominator.
    assert jnp.allclose(pi, pi_r, atol=5e-3), "pi mismatch"
    # Softmax over K sums to ~1 (limited by the approx reciprocal).
    assert jnp.allclose(jnp.sum(pi, axis=2), 1.0, atol=5e-3)

    print("KERNEL_OK")
</pallas_src>

<mosaic_0001>
module attributes {stable_mosaic.version = 11 : i64} {
  func.func @_mdn_kernel(%arg0: i32, %arg1: memref<16x16xbf16, #tpu.memory_space<vmem>>, %arg2: memref<16x128xbf16, #tpu.memory_space<vmem>>, %arg3: memref<1x128xf32, #tpu.memory_space<vmem>>, %arg4: memref<128x128xbf16, #tpu.memory_space<vmem>>, %arg5: memref<16x128xf32, #tpu.memory_space<vmem>>) attributes {dimension_semantics = [#tpu.dimension_semantics<parallel>], iteration_bounds = array<i64: 1>, scalar_prefetch = 0 : i64, scratch_operands = 0 : i64, tpu.core_type = #tpu.core_type<tc>, window_params = [{transform_indices = @transform_0, window_bounds = array<i64: 16, 16>}, {pipeline_mode = #tpu.pipeline_mode<synchronous>, transform_indices = @transform_1, window_bounds = array<i64: 16, 128>}, {pipeline_mode = #tpu.pipeline_mode<synchronous>, transform_indices = @transform_2, window_bounds = array<i64: 1, 128>}, {pipeline_mode = #tpu.pipeline_mode<synchronous>, transform_indices = @transform_3, window_bounds = array<i64: 128, 128>}, {transform_indices = @transform_4, window_bounds = array<i64: 16, 128>}]} {
    %c0 = arith.constant 0 : index
    %c0_0 = arith.constant 0 : index
    %0 = vector.load %arg1[%c0, %c0_0] : memref<16x16xbf16, #tpu.memory_space<vmem>>, vector<16x16xbf16>
    %c0_1 = arith.constant 0 : index
    %c0_2 = arith.constant 0 : index
    %1 = vector.load %arg2[%c0_1, %c0_2] : memref<16x128xbf16, #tpu.memory_space<vmem>>, vector<16x128xbf16>
    %cst = arith.constant dense<0.000000e+00> : vector<16x128xf32>
    %2 = tpu.matmul %0, %1, %cst {dimension_numbers = #tpu.dot_dimension_numbers<[1], [0], [0], [1], [0, 0, 1, 1], [], []>} : vector<16x16xbf16>, vector<16x128xbf16>, vector<16x128xf32> -> vector<16x128xf32>
    %c0_3 = arith.constant 0 : index
    %c0_4 = arith.constant 0 : index
    %3 = vector.load %arg3[%c0_3, %c0_4] : memref<1x128xf32, #tpu.memory_space<vmem>>, vector<1x128xf32>
    %4 = vector.broadcast %3 : vector<1x128xf32> to vector<16x128xf32>
    %5 = arith.addf %2, %4 : vector<16x128xf32>
    %6 = tpu.iota {dimensions = array<i32: 1>} : vector<16x128xi32>
    %c12_i32 = arith.constant 12 : i32
    %7 = vector.broadcast %c12_i32 : i32 to vector<16x128xi32>
    %8 = arith.cmpi slt, %6, %7 : vector<16x128xi32>
    %c12_i32_5 = arith.constant 12 : i32
    %9 = vector.broadcast %c12_i32_5 : i32 to vector<16x128xi32>
    %10 = arith.cmpi sge, %6, %9 : vector<16x128xi32>
    %c24_i32 = arith.constant 24 : i32
    %11 = vector.broadcast %c24_i32 : i32 to vector<16x128xi32>
    %12 = arith.cmpi slt, %6, %11 : vector<16x128xi32>
    %13 = arith.andi %10, %12 : vector<16x128xi1>
    %cst_6 = arith.constant -1.000000e+30 : f32
    %14 = vector.broadcast %cst_6 : f32 to vector<16x128xf32>
    %15 = arith.select %8, %5, %14 : vector<16x128xi1>, vector<16x128xf32>
    %cst_7 = arith.constant dense<0xFF800000> : vector<16xf32>
    %16 = vector.multi_reduction <maximumf>, %15, %cst_7 [1] : vector<16x128xf32> to vector<16xf32>
    %17 = vector.shape_cast %16 : vector<16xf32> to vector<16x1xf32>
    %18 = vector.broadcast %17 : vector<16x1xf32> to vector<16x128xf32>
    %19 = arith.subf %5, %18 : vector<16x128xf32>
    %cst_8 = arith.constant 0.000000e+00 : f32
    %20 = vector.broadcast %cst_8 : f32 to vector<16x128xf32>
    %21 = arith.select %13, %5, %20 : vector<16x128xi1>, vector<16x128xf32>
    %22 = arith.select %8, %19, %21 : vector<16x128xi1>, vector<16x128xf32>
    %23 = math.exp %22 : vector<16x128xf32>
    %c0_9 = arith.constant 0 : index
    %c0_10 = arith.constant 0 : index
    %24 = vector.load %arg4[%c0_9, %c0_10] : memref<128x128xbf16, #tpu.memory_space<vmem>>, vector<128x128xbf16>
    %25 = arith.truncf %23 : vector<16x128xf32> to vector<16x128xbf16>
    %26 = arith.extf %25 : vector<16x128xbf16> to vector<16x128xf32>
    %27 = arith.subf %23, %26 : vector<16x128xf32>
    %28 = arith.truncf %27 : vector<16x128xf32> to vector<16x128xbf16>
    %cst_11 = arith.constant dense<0.000000e+00> : vector<16x128xf32>
    %29 = tpu.matmul %25, %24, %cst_11 {dimension_numbers = #tpu.dot_dimension_numbers<[1], [0], [0], [1], [0, 0, 1, 1], [], []>} : vector<16x128xbf16>, vector<128x128xbf16>, vector<16x128xf32> -> vector<16x128xf32>
    %cst_12 = arith.constant dense<0.000000e+00> : vector<16x128xf32>
    %30 = tpu.matmul %28, %24, %cst_12 {dimension_numbers = #tpu.dot_dimension_numbers<[1], [0], [0], [1], [0, 0, 1, 1], [], []>} : vector<16x128xbf16>, vector<128x128xbf16>, vector<16x128xf32> -> vector<16x128xf32>
    %31 = arith.addf %29, %30 : vector<16x128xf32>
    %32 = tpu.reciprocal %31 {approx = true} : vector<16x128xf32> -> vector<16x128xf32>
    %33 = arith.mulf %23, %32 : vector<16x128xf32>
    %34 = arith.select %13, %23, %5 : vector<16x128xi1>, vector<16x128xf32>
    %35 = arith.select %8, %33, %34 : vector<16x128xi1>, vector<16x128xf32>
    %c0_13 = arith.constant 0 : index
    %c0_14 = arith.constant 0 : index
    %36 = vector.load %arg5[%c0_13, %c0_14] : memref<16x128xf32, #tpu.memory_space<vmem>>, vector<16x128xf32>
    tpu.vector_store %arg5[%c0_13, %c0_14], %35 {strides = array<i32>} : memref<16x128xf32, #tpu.memory_space<vmem>>, vector<16x128xf32>,
    return
  }
  func.func @transform_0(%arg0: i32) -> (i32, i32) {
    %c0_i32 = arith.constant 0 : i32
    %c0_i32_0 = arith.constant 0 : i32
    return %arg0, %c0_i32 : i32, i32
  }
  func.func @transform_1(%arg0: i32) -> (i32, i32) {
    %c0_i32 = arith.constant 0 : i32
    %c0_i32_0 = arith.constant 0 : i32
    %c0_i32_1 = arith.constant 0 : i32
    return %c0_i32, %c0_i32_0 : i32, i32
  }
  func.func @transform_2(%arg0: i32) -> (i32, i32) {
    %c0_i32 = arith.constant 0 : i32
    %c0_i32_0 = arith.constant 0 : i32
    %c0_i32_1 = arith.constant 0 : i32
    return %c0_i32, %c0_i32_0 : i32, i32
  }
  func.func @transform_3(%arg0: i32) -> (i32, i32) {
    %c0_i32 = arith.constant 0 : i32
    %c0_i32_0 = arith.constant 0 : i32
    %c0_i32_1 = arith.constant 0 : i32
    return %c0_i32, %c0_i32_0 : i32, i32
  }
  func.func @transform_4(%arg0: i32) -> (i32, i32) {
    %c0_i32 = arith.constant 0 : i32
    %c0_i32_0 = arith.constant 0 : i32
    return %arg0, %c0_i32 : i32, i32
  }
}

</mosaic_0001>

<bundles_post_ra>
// kernel: tpu_custom_call.1
= control target key start
LH: loop header
LB: loop body
LE: loop exit
PB: predicated region body
PF: predicated region fallthrough
CT: control target
= control target key end

     0   :  { %9 = vsyncpa [#allocation3], 0  ;;  %s519_s0 = inlined_call_operand.hbm [shape: bf16[16,16], index: 0, kind: input, shape index: {}]   ;;  %s520_s1 = inlined_call_operand.hbm [shape: bf16[16,128], index: 1, kind: input, shape index: {}]   ;;  %s521_s2 = inlined_call_operand.vmem [shape: f32[1,128], index: 2, kind: input, shape index: {}]   ;;  %s522_s3 = inlined_call_operand.hbm [shape: bf16[128,128], index: 3, kind: input, shape index: {}]   ;;  %s523_s4 = inlined_call_operand.hbm [shape: f32[16,128], index: 4, kind: output, shape index: {}]  }
   0x1   :  { %10 = vsyncpa [#allocation6], 0 }
   0x2   :  { %11 = vsyncpa [#allocation4], 0  ;;  %s29_s17 = sshll.u32 %s520_s1, 4  ;;  %s430_s18 = smov [#allocation5]   ;;  %s30_s17 = int_to_ptr.hbm [resolvable:$true] %s29_s17 }
   0x3   :  { %s31_s19 = sshll.u32 %s430_s18, 4  ;;  %s16_s22 = sshll.u32 %s519_s0, 4  ;;  %s32_s19 = int_to_ptr.vmem [resolvable:$true] %s31_s19  ;;  %s17_s22 = int_to_ptr.hbm [resolvable:$true] %s16_s22 }
   0x4   :  { %s431_s23 = smov 64   ;;  %s432_s24 = smov 4  }
   0x5   :  { %37 = dma.hbm_to_vmem [thread:$0]  %s30_s17, 128, %s32_s19, [#allocation6], %s431_s23, %s431_s23, %s432_s24  }
   0x6   :  { %s433_s25 = smov [#allocation2]   ;;  %s44_s29 = sshll.u32 %s522_s3, 4  ;;  %s45_s29 = int_to_ptr.hbm [resolvable:$true] %s44_s29 }
   0x7   :  { %s18_s26 = sshll.u32 %s433_s25, 4  ;;  %s434_s1 = smov [#allocation7]   ;;  %s19_s26 = int_to_ptr.vmem [resolvable:$true] %s18_s26 }
   0x8   :  { %24 = dma.hbm_to_vmem [thread:$0]  %s17_s22, 128, %s19_s26, [#allocation3], %s431_s23, %s431_s23, %s432_s24  }
   0x9   :  { %s46_s30 = sshll.u32 %s434_s1, 4  ;;  %s47_s30 = int_to_ptr.vmem [resolvable:$true] %s46_s30 }
   0xa   :  { %52 = dma.hbm_to_vmem [thread:$0]  %s45_s29, 1024, %s47_s30, [#allocation6], %s431_s23, %s431_s23, %s432_s24  }
   0xb   :  { %424 = dma.done.wait [#allocation3], 128  }
   0xc   :  { %425 = vsyncadd [#allocation3], 4294967168 }
   0xd   :  { %426 = dma.done.wait [#allocation6], 1152  }
   0xe   :  { %427 = vsyncadd [#allocation6], 4294966144  ;;  %v302_v0 = vld [vmem:[#allocation5] sm:$0xff]  ;;  %v301_v1 = vld [vmem:[#allocation2] sm:$0xff]  ;;  %vm85_vm0 = vcmask 130048   ;;  %v103_v4 = vlaneseq  ;;  %s246_s8 = sshll.u32 %s523_s4, 4  ;;  %s247_s8 = int_to_ptr.hbm [resolvable:$true] %s246_s8 }
   0xf   :  { %96 = vmatpush.bf16.msra.mxu0 %v302_v0  ;;  %v310_v2 = vld [vmem:[#allocation7 + $0x38] sm:$0xff]  ;;  %v309_v3 = vld [vmem:[#allocation7 + $0x30] sm:$0xff]  ;;  %v308_v13 = vld [vmem:[#allocation7 + $0x28] sm:$0xff]  ;;  %s436_s9 = smov 128   ;;  %s437_s10 = smov 8  }
  0x10   :  { %216 = vmatpush.bf16.msra.mxu2 %v310_v2  ;;  %196 = vmatpush.bf16.msra.mxu1 %v310_v2  ;;  %v472_v5 = vand.u32 127, %v103_v4  ;;  %v319_v6 = vld [vmem:[%s521_s2] ss:$0 sm:$0xff]  ;;  %v307_v14 = vld [vmem:[#allocation7 + $0x20] sm:$0xff]  ;;  %v306_v15 = vld [vmem:[#allocation7 + $0x18] sm:$0xff]  ;;  %s435_s2 = smov [#allocation8]  }
  0x11   :  { %v305_v16 = vld [vmem:[#allocation7 + $0x10] sm:$0xff]  ;;  %v304_v17 = vld [vmem:[#allocation7 + $0x8] sm:$0xff]  ;;  %v303_v18 = vld [vmem:[#allocation7] sm:$0xff]  ;;  %s244_s5 = sshll.u32 %s435_s2, 4  ;;  %s245_s5 = int_to_ptr.vmem [resolvable:$true] %s244_s5 }
  0x12   :  { %268 = vmatmul.msk.bf16.vlgmr.msra.gmra.mxu0 %vm85_vm0, %v301_v1  ;;  %vm105_vm1 = vcmp.lt.s32.totalorder %v472_v5, 12  ;;  %vm106_vm2 = vcmp.ge.s32.totalorder %v472_v5, 12  ;;  %vm107_vm3 = vcmp.lt.s32.totalorder %v472_v5, 24 }
  0x13   :  { %vm490_vm4 = vmand %vm106_vm2, %vm107_vm3 }
  0x14   :  { %217 = vmatpush.bf16.msra.mxu2 %v309_v3  ;;  %197 = vmatpush.bf16.msra.mxu1 %v309_v3 }
  0x18   :  { %218 = vmatpush.bf16.msra.mxu2 %v308_v13  ;;  %198 = vmatpush.bf16.msra.mxu1 %v308_v13 }
  0x1c   :  { %219 = vmatpush.bf16.msra.mxu2 %v307_v14  ;;  %199 = vmatpush.bf16.msra.mxu1 %v307_v14 }
  0x20   :  { %220 = vmatpush.bf16.msra.mxu2 %v306_v15  ;;  %200 = vmatpush.bf16.msra.mxu1 %v306_v15 }
  0x24   :  { %221 = vmatpush.bf16.msra.mxu2 %v305_v16  ;;  %201 = vmatpush.bf16.msra.mxu1 %v305_v16 }
  0x28   :  { %222 = vmatpush.bf16.msra.mxu2 %v304_v17  ;;  %202 = vmatpush.bf16.msra.mxu1 %v304_v17 }
  0x2c   :  { %223 = vmatpush.bf16.msra.mxu2 %v303_v18  ;;  %203 = vmatpush.bf16.msra.mxu1 %v303_v18 }
  0x8f   :  { %v98_v7 = vpop.f32.mrf.mxu0 }
  0x90   :  { %v478_v8 = vadd.f32 %v319_v6, %v98_v7 }
  0x92   :  { %v109_v9 = vsel %vm105_vm1, %v478_v8, -1e+30  ;;  %v117_v22 = vsel %vm490_vm4, %v478_v8, 0.0 }
  0x93   :  { %111 = vmax.xlane.f32.xlu0 %v109_v9 }
  0x97   :  { %v100_v10 = vpop.f32.mrf.mxu0 }
  0x98   :  { %v483_v11 = vadd.f32 %v319_v6, %v100_v10 }
  0x9a   :  { %v110_v12 = vsel %vm105_vm1, %v483_v11, -1e+30  ;;  %v118_v27 = vsel %vm490_vm4, %v483_v11, 0.0 }
  0x9b   :  { %113 = vmax.xlane.f32.xlu0 %v110_v12 }
 0x106   :  { %v112_v20 = vpop.xlane.xlu0 %111 }
 0x107   :  { %v115_v21 = vsub.f32 %v478_v8, %v112_v20 }
 0x109   :  { %v119_v23 = vsel %vm105_vm1, %v115_v21, %v117_v22 }
 0x10a   :  { %v121_v24 = vmul.f32 1.442695, %v119_v23 }
 0x10c   :  { %320 = vpow2.f32 %v121_v24 }
 0x10e   :  { %v114_v25 = vpop.xlane.xlu0 %113 }
 0x10f   :  { %v116_v26 = vsub.f32 %v483_v11, %v114_v25 }
 0x111   :  { %v120_v28 = vsel %vm105_vm1, %v116_v26, %v118_v27 }
 0x112   :  { %v123_v29 = vmul.f32 1.442695, %v120_v28  ;;  %v321_v30 = vpop.eup %320 }
 0x113   :  { %v141_v31 = vpack.c.bf16 %v321_v30, %v321_v30  ;;  %v234_v50 = vsel %vm490_vm4, %v321_v30, %v478_v8 }
 0x114   :  { %322 = vpow2.f32 %v123_v29 }
 0x115   :  { %v143_v34 = vunpack.c.l.bf16 %v141_v31  ;;  %v212_v35 = vunpack.c.l.b16 %v141_v31 }
 0x117   :  { %v145_v39 = vsub.f32 %v321_v30, %v143_v34 }
 0x11a   :  { %v323_v32 = vpop.eup %322 }
 0x11b   :  { %v142_v33 = vpack.c.bf16 %v323_v32, %v323_v32  ;;  %v235_v54 = vsel %vm490_vm4, %v323_v32, %v483_v11 }
 0x11d   :  { %v213_v36 = vunpack.c.l.b16 %v142_v33  ;;  %v144_v37 = vunpack.c.l.bf16 %v142_v33 }
 0x11f   :  { %v214_v38 = vpack.c.b16 %v213_v36, %v212_v35  ;;  %v146_v40 = vsub.f32 %v323_v32, %v144_v37 }
 0x121   :  { %224 = vmatmul.bf16.vlgmr.msra.gmra.mxu2 %v214_v38  ;;  %v147_v41 = vpack.c.bf16 %v146_v40, %v145_v39 }
 0x123   :  { %204 = vmatmul.bf16.vlgmr.msra.gmra.mxu1 %v147_v41 }
 0x1a0   :  { %v205_v42 = vpop.f32.mrf.mxu1 }
 0x1a4   :  { %v225_v43 = vpop.f32.mrf.mxu2 }
 0x1a5   :  { %v226_v44 = vadd.f32 %v225_v43, %v205_v42 }
 0x1a7   :  { %324 = vrcp.f32 %v226_v44 }
 0x1a8   :  { %v207_v45 = vpop.f32.mrf.mxu1 }
 0x1ac   :  { %v227_v46 = vpop.f32.mrf.mxu2 }
 0x1ad   :  { %v325_v47 = vpop.eup %324  ;;  %v228_v48 = vadd.f32 %v227_v46, %v207_v45 }
 0x1ae   :  { %v232_v49 = vmul.f32 %v325_v47, %v321_v30 }
 0x1af   :  { %326 = vrcp.f32 %v228_v48 }
 0x1b0   :  { %v236_v51 = vsel %vm105_vm1, %v232_v49, %v234_v50 }
 0x1b1   :  { %238 = vst [vmem:[#allocation8] sm:$0xff] %v236_v51 }
 0x1b5   :  { %v327_v52 = vpop.eup %326 }
 0x1b6   :  { %v233_v53 = vmul.f32 %v327_v52, %v323_v32 }
 0x1b8   :  { %v237_v55 = vsel %vm105_vm1, %v233_v53, %v235_v54 }
 0x1b9   :  { %239 = vst [vmem:[#allocation8 + $0x8] sm:$0xff] %v237_v55 }
 0x1ba   :  { %252 = dma.vmem_to_hbm [thread:$0]  %s245_s5, 256, %s247_s8, [#allocation4], %s436_s9, %s436_s9, %s437_s10  }
 0x1bb   :  { %428 = dma.done.wait [#allocation4], 256  }
 0x1bc   :  { %429 = vsyncadd [#allocation4], 4294967040 }
 0x1bd   :  { %257 = vsyncpa [#allocation3], 1 }
 0x1be   :  { %258 = vsyncpa [#allocation6], 1 }
 0x1bf   :  { %259 = vsyncpa [#allocation4], 1 }

</bundles_post_ra>
